<compile_context>
chip_gen: v7x
topology: tpu7x:2x2x1
jax: 0.10.0
libtpu: 0.0.40
codegen_flags: <defaults>
</compile_context>

<pallas_src>
import jax
import jax.numpy as jnp
from jax.experimental import pallas as pl
from jax.experimental.pallas import tpu as pltpu

_LANE = 128
_MAX_BLOCK_BYTES = 4 * 1024 * 1024      # per-input-block VMEM footprint (bytes-based cap)
_VMEM_LIMIT_BYTES = 32 * 1024 * 1024    # covers ~4x block bytes (dbl-buffered in+out) + headroom


def _dbrelu_kernel(v_th_ref, x_ref, o_ref):
    # out = clamp(x / v_th, 0, 1). Division hits the EUP slot; this kernel is
    # HBM-bound so the arithmetic is free filler.
    v_th = v_th_ref[0]
    x = x_ref[...].astype(jnp.float32)
    o_ref[...] = jnp.clip(x / v_th, 0.0, 1.0).astype(o_ref.dtype)


def _dbrelu_2d(x2d: jax.Array, v_th_arr: jax.Array) -> jax.Array:
    """Run the kernel on a lane-dense (rows, 128) slab."""
    rows, lane = x2d.shape
    itemsize = jnp.dtype(x2d.dtype).itemsize

    # Bytes-based block sizing: up to ~4 MiB per block (8192 rows f32,
    # 16384 rows bf16). Keep grid >= 2 when possible so v7x megacore can
    # shard the "parallel" axis; tiny inputs get a single full-extent block.
    cap_rows = max(8, _MAX_BLOCK_BYTES // (lane * itemsize))
    if rows <= 8:
        block_rows = rows                           # full extent (allowed < 8)
    else:
        half = pl.cdiv(rows, 2)
        block_rows = min(cap_rows, ((half + 7) // 8) * 8)  # multiple of 8
    grid = (pl.cdiv(rows, block_rows),)

    return pl.pallas_call(
        _dbrelu_kernel,
        out_shape=jax.ShapeDtypeStruct((rows, lane), x2d.dtype),
        grid=grid,
        in_specs=[
            pl.BlockSpec(memory_space=pltpu.MemorySpace.SMEM),   # v_th scalar
            pl.BlockSpec((block_rows, lane), lambda i: (i, 0)),
        ],
        out_specs=pl.BlockSpec((block_rows, lane), lambda i: (i, 0)),
        compiler_params=pltpu.CompilerParams(
            dimension_semantics=("parallel",),
            vmem_limit_bytes=_VMEM_LIMIT_BYTES,
        ),
        cost_estimate=pl.CostEstimate(
            flops=2 * rows * lane,                  # div + clip per element
            transcendentals=0,
            bytes_accessed=2 * rows * lane * itemsize,
        ),
    )(v_th_arr, x2d)


def dbrelu(inputs: jax.Array, v_th) -> jax.Array:
    """Elementwise clamp(inputs / v_th, 0, 1) via a Pallas TPU kernel."""
    x = inputs
    if not jnp.issubdtype(x.dtype, jnp.floating):
        # Match torch's int-tensor / float-scalar promotion.
        x = x.astype(jnp.float32)
    out_dtype = x.dtype

    v_th_arr = jnp.asarray([v_th], dtype=jnp.float32)

    n = x.size
    flat = x.reshape(-1)
    n_main = (n // _LANE) * _LANE                   # 128-aligned prefix

    parts = []
    if n_main > 0:
        main = flat if n_main == n else flat[:n_main]
        x2d = main.reshape(n_main // _LANE, _LANE)
        parts.append(_dbrelu_2d(x2d, v_th_arr).reshape(-1))
    if n_main < n:
        # <128-element tail: plain jnp, O(tail) extra traffic only.
        tail = flat[n_main:]
        tail_out = jnp.clip(tail.astype(jnp.float32) / v_th_arr[0], 0.0, 1.0)
        parts.append(tail_out.astype(out_dtype))

    out_flat = parts[0] if len(parts) == 1 else jnp.concatenate(parts)
    return out_flat.reshape(inputs.shape)


if __name__ == "__main__":
    key = jax.random.PRNGKey(0)
    # Small NCHW input consistent with typical SNN conv activations.
    x = jax.random.normal(key, (2, 4, 16, 16), dtype=jnp.float32) * 2.0
    v_th = 1.5  # threshold parameter from DBReLU.__init__

    out = jax.block_until_ready(dbrelu(x, v_th))

    # Reference check in plain JAX (same math as torch.clamp(x / v_th, 0, 1)).
    ref = jnp.clip(x / v_th, 0.0, 1.0)
    assert out.shape == x.shape and out.dtype == x.dtype
    assert jnp.max(jnp.abs(out - ref)) < 1e-6

    # Ragged size: exercises the 128-aligned-prefix kernel path + jnp tail.
    x_ragged = jax.random.normal(jax.random.PRNGKey(1), (3, 5, 17), jnp.float32)
    out_r = jax.block_until_ready(dbrelu(x_ragged, v_th))
    ref_r = jnp.clip(x_ragged / v_th, 0.0, 1.0)
    assert out_r.shape == x_ragged.shape
    assert jnp.max(jnp.abs(out_r - ref_r)) < 1e-6

    print("KERNEL_OK")
</pallas_src>

<mosaic_0001>
module attributes {stable_mosaic.version = 11 : i64} {
  func.func @_dbrelu_kernel(%arg0: i32, %arg1: memref<1xf32, #tpu.memory_space<smem>>, %arg2: memref<8x128xf32, #tpu.memory_space<vmem>>, %arg3: memref<8x128xf32, #tpu.memory_space<vmem>>) attributes {dimension_semantics = [#tpu.dimension_semantics<parallel>], iteration_bounds = array<i64: 2>, scalar_prefetch = 0 : i64, scratch_operands = 0 : i64, tpu.core_type = #tpu.core_type<tc>, window_params = [{transform_indices = @transform_0, window_bounds = array<i64: 1>}, {transform_indices = @transform_1, window_bounds = array<i64: 8, 128>}, {transform_indices = @transform_2, window_bounds = array<i64: 8, 128>}]} {
    %c0 = arith.constant 0 : index
    %0 = memref.load %arg1[%c0] : memref<1xf32, #tpu.memory_space<smem>>
    %c0_0 = arith.constant 0 : index
    %c0_1 = arith.constant 0 : index
    %1 = vector.load %arg2[%c0_0, %c0_1] : memref<8x128xf32, #tpu.memory_space<vmem>>, vector<8x128xf32>
    %2 = vector.broadcast %0 : f32 to vector<8x128xf32>
    %3 = arith.divf %1, %2 : vector<8x128xf32>
    %cst = arith.constant 0.000000e+00 : f32
    %cst_2 = arith.constant 1.000000e+00 : f32
    %4 = vector.broadcast %cst : f32 to vector<8x128xf32>
    %5 = arith.maximumf %4, %3 : vector<8x128xf32>
    %6 = vector.broadcast %cst_2 : f32 to vector<8x128xf32>
    %7 = arith.minimumf %6, %5 : vector<8x128xf32>
    %c0_3 = arith.constant 0 : index
    %c0_4 = arith.constant 0 : index
    %8 = vector.load %arg3[%c0_3, %c0_4] : memref<8x128xf32, #tpu.memory_space<vmem>>, vector<8x128xf32>
    tpu.vector_store %arg3[%c0_3, %c0_4], %7 {strides = array<i32>} : memref<8x128xf32, #tpu.memory_space<vmem>>, vector<8x128xf32>,
    return
  }
  func.func @transform_0(%arg0: i32) -> i32 {
    %c0_i32 = arith.constant 0 : i32
    %c0_i32_0 = arith.constant 0 : i32
    return %c0_i32 : i32
  }
  func.func @transform_1(%arg0: i32) -> (i32, i32) {
    %c0_i32 = arith.constant 0 : i32
    %c0_i32_0 = arith.constant 0 : i32
    return %arg0, %c0_i32 : i32, i32
  }
  func.func @transform_2(%arg0: i32) -> (i32, i32) {
    %c0_i32 = arith.constant 0 : i32
    %c0_i32_0 = arith.constant 0 : i32
    return %arg0, %c0_i32 : i32, i32
  }
}

</mosaic_0001>

<bundles_post_ra>
// kernel: tpu_custom_call.1
= control target key start
LH: loop header
LB: loop body
LE: loop exit
PB: predicated region body
PF: predicated region fallthrough
CT: control target
= control target key end

     0   :  { %s591_s0 = inlined_call_operand.<no memory space> [shape: f32[1], index: 0, kind: input, shape index: {}]   ;;  %s592_s1 = inlined_call_operand.hbm [shape: f32[16,128], index: 1, kind: input, shape index: {}]   ;;  %s593_s2 = inlined_call_operand.hbm [shape: f32[16,128], index: 2, kind: output, shape index: {}]  }
   0x1   :  { %7 = sst [smem:[#allocation2]] %s591_s0 }
   0x2   :  { %8 = vsyncpa [#allocation4], 0 }
   0x3   :  { %10 = vsyncpa [#allocation4 + $0x1], 0 }
   0x4   :  { %11 = vsyncpa [#allocation5], 0 }
   0x5   :  { %13 = vsyncpa [#allocation5 + $0x1], 0  ;;  %s430_s11 = smov 0   ;;  %s432_s12 = smov 0  }
   0x6   :  { %s434_s13 = smov 0   ;;  %s436_s14 = smov 0  }
   0x7 LB: > { %s451_s0 = sadd.s32 4294967295, %s408_s14   ;;  %s252_s15 = sadd.s32 4294967294, %s408_s14   ;;  %s408_s14 = sphi %s436_s14, %s608_s14   ;;  %s404_s13 = sphi %s434_s13, %s607_s13   ;;  %s400_s12 = sphi %s432_s12, %s606_s12   ;;  %s396_s11 = sphi %s430_s11, %s605_s11  }
   0x8   : > { %s455_s16 = sadd.s32 1, %s408_s14   ;;  %s47_s17 = sadd.s32 1, %s404_s13 }
   0x9   : > { %s44_s18 = ssub.s32 %s408_s14, %s455_s16  ;;  %p54_p0 = scmp.ne.s32.totalorder %s404_s13, %s400_s12 }
   0xa   : > { %p45_p1 = scmp.eq.s32.totalorder %s44_s18, 0  ;;  %p55_p2 = scmp.eq.s32.totalorder %s408_s14, 0 }
   0xb   : > { %p60_p3 = scmp.ne.s32.totalorder %s400_s12, %s396_s11  ;;  %p61_p4 = scmp.eq.s32.totalorder %s451_s0, 0 }
   0xc   : > { %s467_s19 = scalar_select %p45_p1, %s404_s13, %s47_s17  }
   0xd   : > { %p469_p5 = por %p55_p2, %p54_p0  ;;  %p473_p6 = por %p61_p4, %p60_p3 }
   0xe   : > { %p84_p7 = scmp.eq.s32.totalorder %s451_s0, 1  ;;  %p90_p8 = scmp.eq.s32.totalorder %s252_s15, 1 }
   0xf   : > { %p276_p10 = scmp.lt.s32.totalorder %s408_s14, 2  ;;  %s113_s24 = sand.u32 1, %s404_s13  }
  0x10   : > { %p480_p11 = por %p84_p7, %p54_p0  ;;  %p484_p12 = por %p90_p8, %p60_p3 }
  0x11   : > { %s256_s25 = sshll.u32 %s408_s14, 7  ;;  %s255_s26 = sshll.u32 %s113_s24, 3 }
  0x12   : > { %s597_s22 = scalar_select %p480_p11, 1, 0 }
  0x13   : > { %s598_s23 = scalar_select %p484_p12, 1, 0 }
  0x14   : > { %s493_s29 = scalar_lea.hbm %s592_s1, %s256_s25  ;;  %s117_s30 = scalar_lea.vmem [#allocation3], %s255_s26 }
  0x15   : > { %s124_s3 = sshll.u32 %s117_s30, 4  ;;  %p497_p13 = pnand %p276_p10, %p469_p5  ;;  %s501_s3 = int_to_ptr.vmem [resolvable:$true] %s124_s3 }
  0x16   : > { %s114_s5 = scalar_lea.sflag [#allocation4], %s113_s24  ;;  %s312_s6 = scalar_lea.hbm %s493_s29, 128 }
  0x17   : > { %p313_p2 = scmp.ne.s32.totalorder %s493_s29, %s312_s6  ;;  %p314_p3 = pneg %p497_p13 }
  0x18   : > { %s317_s9 = scalar_lea.hbm %s592_s1, 256  ;;  %p318_p5 = scmp.lt.u32.totalorder %s493_s29, %s592_s1 }
  0x19   : > { %p315_p4 = pnand %p314_p3, %p313_p2  ;;  %p319_p8 = scmp.lt.u32.totalorder %s317_s9, %s312_s6 }
  0x1a   : > { %p321_p9 = scmp.lt.u32.totalorder %s312_s6, %s493_s29 }
  0x1b   : > { %p316_p7 = pneg %p315_p4  ;;  %p320_p10 = por %p319_p8, %p318_p5 }
  0x1d   : > { %p322_p0 = por %p321_p9, %p320_p10 }
  0x1f   : > { %p323_p1 = pnand %p322_p0, %p316_p7 }
  0x21   : > { %326 = shalt.err (!%p323_p1)
}
  0x22   : > { %s327_s17 = scalar_lea.vmem %s501_s3, 128  ;;  %s410_s18 = smov [#allocation3]  }
  0x23   : > { %p328_p2 = scmp.ne.s32.totalorder %s501_s3, %s327_s17  ;;  %s332_s20 = sshll.u32 %s410_s18, 4  ;;  %s333_s20 = int_to_ptr.vmem [resolvable:$false] %s332_s20 }
  0x24   : > { %s334_s24 = scalar_lea.vmem %s333_s20, 256  ;;  %p335_p11 = scmp.lt.s32.totalorder %s501_s3, %s333_s20 }
  0x25   : > { %p330_p4 = pnand %p328_p2, %p314_p3  ;;  %p336_p5 = scmp.lt.s32.totalorder %s334_s24, %s327_s17 }
  0x27   : > { %p331_p12 = pneg %p330_p4  ;;  %p337_p8 = por %p336_p5, %p335_p11 }
  0x29   : > { %p338_p9 = pnand %p337_p8, %p331_p12 }
  0x2b   : > { %341 = shalt.err (!%p338_p9)
}
  0x2c   : > { %271 = dma.hbm_to_vmem [thread:$0]  (!%p497_p13), %s493_s29, 128, %s501_s3, %s114_s5  }
  0x2d   : > { %p600_p0 = scmp.lt.s32.totalorder %s408_s14, 3  ;;  %p601_p1 = scmp.ge.s32.totalorder %s408_s14, 1 }
  0x2f   : > { %p130_p3 = pnand %p601_p1, %p600_p0 }
  0x30   : > { %s535_s25 = sand.u32 (!%p130_p3), 1, %s400_s12  }
  0x31   : > { %133 = sbr.rel (%p130_p3) target bundleno = 95 (0x5f), region = 28  ;;  %s258_s26 = sshll.u32 (!%p130_p3), %s535_s25, 3 }
  0x32   : > { %s136_s27 = scalar_lea.sflag (!%p130_p3), [#allocation4], %s535_s25  ;;  %s139_s28 = scalar_lea.vmem (!%p130_p3), [#allocation3], %s258_s26 }
  0x38   : > { %387 = dma.done.wait (%p473_p6), %s136_s27, 128  }
  0x39   : > { %389 = vsyncadd (%p473_p6), %s136_s27, 4294967168  ;;  %s160_s29 = sld [smem:[#allocation2]]  ;;  %v161_v1 = vld [vmem:[%s139_s28] sm:$0xff]  ;;  %s159_s30 = scalar_lea.vmem [#allocation6], %s258_s26 }
  0x3a   : > { %s182_s3 = sshll.u32 %s159_s30, 4  ;;  %s261_s4 = sshll.u32 %s451_s0, 7  ;;  %s544_s3 = int_to_ptr.vmem [resolvable:$true] %s182_s3 }
  0x3b   : > { %s549_s21 = scalar_lea.hbm %s593_s2, %s261_s4  ;;  %s169_s7 = scalar_lea.sflag [#allocation5], %s535_s25 }
  0x3c   : > { %s342_s8 = scalar_lea.vmem %s544_s3, 128  ;;  %p602_p11 = scmp.ne.s32.totalorder %s597_s22, 0 }
  0x3d   : > { %p343_p6 = scmp.ne.s32.totalorder %s544_s3, %s342_s8  ;;  %s411_s0 = smov [#allocation6]  }
  0x3e   : > { %s346_s9 = sshll.u32 %s411_s0, 4  ;;  %s347_s9 = int_to_ptr.vmem [resolvable:$false] %s346_s9 }
  0x3f   : > { %v162_v0 = vstv %s160_s29  ;;  %p344_p12 = pnand %p343_p6, %p602_p11  ;;  %s348_s10 = scalar_lea.vmem %s347_s9, 256 }
  0x40   : > { %310 = vrcp.f32 %v162_v0  ;;  %p349_p7 = scmp.lt.s32.totalorder %s544_s3, %s347_s9  ;;  %p350_p10 = scmp.lt.s32.totalorder %s348_s10, %s342_s8 }
  0x41   : > { %p345_p13 = pneg %p344_p12 }
  0x42   : > { %p351_p2 = por %p350_p10, %p349_p7 }
  0x44   : > { %p352_p4 = pnand %p351_p2, %p345_p13 }
  0x4a   : > { %v311_v2 = vpop.eup %310 }
  0x4b   : > { %v164_v3 = vmul.f32 %v311_v2, %v161_v1 }
  0x4d   : > { %v165_v4 = vmax.f32 %v164_v3, 0.0 }
  0x4f   : > { %v166_v5 = vmin.f32 %v165_v4, 1.0 }
  0x51   : > { %167 = vst [vmem:[%s159_s30] sm:$0xff] %v166_v5 }
  0x52   : > { %355 = shalt.err (!%p352_p4)
}
  0x53   : > { %s356_s15 = scalar_lea.hbm %s549_s21, 128  ;;  %s360_s20 = scalar_lea.hbm %s593_s2, 256 }
  0x54   : > { %p357_p5 = scmp.ne.s32.totalorder %s549_s21, %s356_s15  ;;  %p361_p0 = scmp.lt.u32.totalorder %s549_s21, %s593_s2 }
  0x55   : > { %p362_p1 = scmp.lt.u32.totalorder %s360_s20, %s356_s15  ;;  %p364_p6 = scmp.lt.u32.totalorder %s356_s15, %s549_s21 }
  0x56   : > { %p358_p8 = pnand %p357_p5, %p602_p11 }
  0x57   : > { %p363_p3 = por %p362_p1, %p361_p0 }
  0x58   : > { %p359_p9 = pneg %p358_p8 }
  0x59   : > { %p365_p12 = por %p364_p6, %p363_p3 }
  0x5b   : > { %p366_p13 = pnand %p365_p12, %p359_p9 }
  0x5d   : > { %369 = shalt.err (!%p366_p13)
}
  0x5e   : > { %266 = dma.vmem_to_hbm [thread:$0]  (%p602_p11), %s544_s3, 128, %s549_s21, %s169_s7  }
  0x5f PF: > { %s194_s26 = sand.u32 1, %s396_s11   ;;  %p603_p7 = scmp.ne.s32.totalorder %s598_s23, 0 }
  0x60   : > { %p604_p10 = scmp.ge.s32.totalorder %s408_s14, 2  ;;  %s195_s27 = scalar_lea.sflag [#allocation5], %s194_s26 }
  0x62   : > { %p273_p2 = pnand %p604_p10, %p603_p7 }
  0x64   : > { %391 = dma.done.wait (!%p273_p2), %s195_s27, 128  }
  0x65   : > { %393 = vsyncadd (!%p273_p2), %s195_s27, 4294967168  ;;  %p16_p4 = scmp.ge.s32.totalorder %s455_s16, 4   ;;  %s605_s11 = smov %s400_s12 }
  0x66   : > { %s606_s12 = smov %s404_s13  ;;  %s607_s13 = smov %s467_s19 }
  0x67   : > { %s608_s14 = smov %s455_s16  ;;  %18 = sbr.rel (!%p16_p4) target bundleno = 7 (0x7), region = 73 }
  0x6e   :  { %200 = vsyncpa [#allocation4], 1 }
  0x6f   :  { %202 = vsyncpa [#allocation4 + $0x1], 1 }
  0x70   :  { %203 = vsyncpa [#allocation5], 1 }
  0x71   :  { %205 = vsyncpa [#allocation5 + $0x1], 1 }

</bundles_post_ra>
